<compile_context>
chip_gen: v7x
topology: tpu7x:2x2x1
jax: 0.10.0
libtpu: 0.0.40
codegen_flags: <defaults>
</compile_context>

<pallas_src>
import numpy as np
import jax
import jax.numpy as jnp
from jax import lax
from jax.experimental import pallas as pl
from jax.experimental.pallas import tpu as pltpu

WINDOW_SIZE = 11
SIGMA = 1.5
C1 = 0.01 ** 2
C2 = 0.03 ** 2

# Largest H*W for which the fused (single lane-dense matmul) path is used.
# The fused operator is (H*W, H*W) f32: H*W = 1024 -> 4 MiB (8 MiB double-buffered).
_MAX_FUSED_HW = 1024


# ----------------------------------------------------------------------------
# Host-side constant construction
# ----------------------------------------------------------------------------
def gaussian_1d(window_size, sigma):
    x = np.arange(window_size, dtype=np.float64)
    g = np.exp(-((x - window_size // 2) ** 2) / (2.0 * sigma ** 2))
    return (g / g.sum()).astype(np.float32)


def conv_matrix(n, g):
    """Banded matrix A with (A @ v)[i] = sum_k g[k] * v_zero_padded[i + k]."""
    ws = g.shape[0]
    half = ws // 2
    A = np.zeros((n, n), dtype=np.float32)
    for i in range(n):
        for m in range(n):
            k = m - i + half
            if 0 <= k < ws:
                A[i, m] = g[k]
    return A


# ----------------------------------------------------------------------------
# Kernels
# ----------------------------------------------------------------------------
def _epilogue_sum(mu1, mu2, e_xx, e_yy, e_xy):
    """Per-block sum of the SSIM map (all f32, matches the PyTorch formula)."""
    mu1_sq = mu1 * mu1
    mu2_sq = mu2 * mu2
    mu1_mu2 = mu1 * mu2
    num = (2.0 * mu1_mu2 + C1) * (2.0 * (e_xy - mu1_mu2) + C2)
    den = (mu1_sq + mu2_sq + C1) * ((e_xx - mu1_sq) + (e_yy - mu2_sq) + C2)
    return jnp.sum(num / den)


def _fused_kernel(kt_ref, x_ref, y_ref, out_ref):
    """Small-image path: one (1, H*W) lane-dense row per (image, channel).

    The 2D Gaussian conv is a single matmul against kron(M_H, M_W)^T; no
    concatenation, no transpose, fully lane-dense epilogue.
    """
    x = x_ref[0, 0].astype(jnp.float32)   # (1, HW), upcast AFTER the DMA
    y = y_ref[0, 0].astype(jnp.float32)   # (1, HW)
    kt = kt_ref[...]                      # (HW, HW)

    def conv(z):
        return jnp.dot(z, kt, preferred_element_type=jnp.float32)

    mu1 = conv(x)
    mu2 = conv(y)
    e_xx = conv(x * x)
    e_yy = conv(y * y)
    e_xy = conv(x * y)

    s = _epilogue_sum(mu1, mu2, e_xx, e_yy, e_xy)
    out_ref[...] = jnp.full(out_ref.shape, s, dtype=out_ref.dtype)


def _separable_kernel(awt_ref, ah_ref, x_ref, y_ref, out_ref):
    """Larger-image path: per-(image, channel) separable convs.

    W-conv = right multiply by AW^T; H-conv = LEFT multiply by AH (no
    swapaxes / relayout needed).  No 5C slab is ever materialized.
    """
    x = x_ref[0, 0].astype(jnp.float32)   # (H, W)
    y = y_ref[0, 0].astype(jnp.float32)   # (H, W)
    awt = awt_ref[...]                    # (W, W)
    ah = ah_ref[...]                      # (H, H)

    def conv(z):
        t = jnp.dot(z, awt, preferred_element_type=jnp.float32)    # conv along W
        return jnp.dot(ah, t, preferred_element_type=jnp.float32)  # conv along H

    mu1 = conv(x)
    mu2 = conv(y)
    e_xx = conv(x * x)
    e_yy = conv(y * y)
    e_xy = conv(x * y)

    s = _epilogue_sum(mu1, mu2, e_xx, e_yy, e_xy)
    out_ref[...] = jnp.full(out_ref.shape, s, dtype=out_ref.dtype)


# ----------------------------------------------------------------------------
# pallas_call wrappers
# ----------------------------------------------------------------------------
def _vmem_limit(needed_bytes):
    # Derived from shapes (review item); floor at the default scoped limit,
    # cap at v7x physical VMEM.
    return int(min(64 * 2**20, max(32 * 2**20, 2 * needed_bytes)))


def _ssim_sums_fused(img1, img2, g):
    """Returns (N, C) per-(image, channel) sums of the SSIM map."""
    N, C, H, W = img1.shape
    HW = H * W
    MH = conv_matrix(H, g)
    MW = conv_matrix(W, g)
    kt = jnp.asarray(np.kron(MH, MW).T)       # fused zero-padded 2D conv operator

    # Free HBM reshape: each channel image becomes one lane-dense row.
    x = img1.reshape(N, C, 1, HW)
    y = img2.reshape(N, C, 1, HW)

    itemsize = np.dtype(img1.dtype).itemsize
    needed = (2 * HW * HW * 4              # kt (double-buffered)
              + 2 * 2 * HW * itemsize      # x, y blocks (double-buffered)
              + 20 * HW * 4                # f32 conv outputs + epilogue temps
              + 4 * 128 * 4)               # output blocks

    out = pl.pallas_call(
        _fused_kernel,
        out_shape=jax.ShapeDtypeStruct((N, C, 1, 128), jnp.float32),
        grid_spec=pltpu.PrefetchScalarGridSpec(
            num_scalar_prefetch=0,
            grid=(N, C),
            in_specs=[
                pl.BlockSpec((HW, HW), lambda n, c: (0, 0)),          # constant operator
                pl.BlockSpec((1, 1, 1, HW), lambda n, c: (n, c, 0, 0)),
                pl.BlockSpec((1, 1, 1, HW), lambda n, c: (n, c, 0, 0)),
            ],
            out_specs=pl.BlockSpec((1, 1, 1, 128), lambda n, c: (n, c, 0, 0)),
        ),
        compiler_params=pltpu.CompilerParams(
            dimension_semantics=("parallel", "parallel"),
            vmem_limit_bytes=_vmem_limit(needed)),
    )(kt, x, y)
    return out[:, :, 0, 0]


def _ssim_sums_separable(img1, img2, g):
    """Returns (N, C) per-(image, channel) sums of the SSIM map."""
    N, C, H, W = img1.shape
    awt = jnp.asarray(conv_matrix(W, g).T)    # right-multiply conv along W
    ah = jnp.asarray(conv_matrix(H, g))       # left-multiply conv along H

    itemsize = np.dtype(img1.dtype).itemsize
    needed = (2 * (H * H + W * W) * 4         # AW^T, AH (double-buffered)
              + 2 * 2 * H * W * itemsize      # x, y blocks (double-buffered)
              + 20 * H * W * 4                # f32 conv outputs + epilogue temps
              + 4 * 128 * 4)

    out = pl.pallas_call(
        _separable_kernel,
        out_shape=jax.ShapeDtypeStruct((N, C, 1, 128), jnp.float32),
        grid_spec=pltpu.PrefetchScalarGridSpec(
            num_scalar_prefetch=0,
            grid=(N, C),
            in_specs=[
                pl.BlockSpec((W, W), lambda n, c: (0, 0)),
                pl.BlockSpec((H, H), lambda n, c: (0, 0)),
                pl.BlockSpec((1, 1, H, W), lambda n, c: (n, c, 0, 0)),
                pl.BlockSpec((1, 1, H, W), lambda n, c: (n, c, 0, 0)),
            ],
            out_specs=pl.BlockSpec((1, 1, 1, 128), lambda n, c: (n, c, 0, 0)),
        ),
        compiler_params=pltpu.CompilerParams(
            dimension_semantics=("parallel", "parallel"),
            vmem_limit_bytes=_vmem_limit(needed)),
    )(awt, ah, img1, img2)
    return out[:, :, 0, 0]


def ssim_pallas(img1, img2, window_size=WINDOW_SIZE, size_average=True):
    N, C, H, W = img1.shape
    g = gaussian_1d(window_size, SIGMA)
    if H * W <= _MAX_FUSED_HW:
        sums_nc = _ssim_sums_fused(img1, img2, g)
    else:
        sums_nc = _ssim_sums_separable(img1, img2, g)
    per_image = jnp.sum(sums_nc, axis=1)                     # (N,)
    if size_average:
        return jnp.sum(per_image) / (N * C * H * W)          # ssim_map.mean()
    return per_image / (C * H * W)                           # mean over (C, H, W)


# ----------------------------------------------------------------------------
# Pure-JAX reference mirroring the PyTorch _ssim (for verification only)
# ----------------------------------------------------------------------------
def ssim_reference(img1, img2, window_size=WINDOW_SIZE):
    N, C, H, W = img1.shape
    g = jnp.asarray(gaussian_1d(window_size, SIGMA))
    w2d = jnp.outer(g, g)
    window = jnp.broadcast_to(w2d, (C, 1, window_size, window_size)).astype(jnp.float32)
    pad = window_size // 2

    def conv(x):
        return lax.conv_general_dilated(
            x, window, window_strides=(1, 1),
            padding=[(pad, pad), (pad, pad)],
            dimension_numbers=("NCHW", "OIHW", "NCHW"),
            feature_group_count=C)

    mu1 = conv(img1)
    mu2 = conv(img2)
    mu1_sq, mu2_sq, mu1_mu2 = mu1 * mu1, mu2 * mu2, mu1 * mu2
    sigma1_sq = conv(img1 * img1) - mu1_sq
    sigma2_sq = conv(img2 * img2) - mu2_sq
    sigma12 = conv(img1 * img2) - mu1_mu2
    ssim_map = ((2 * mu1_mu2 + C1) * (2 * sigma12 + C2)) / (
        (mu1_sq + mu2_sq + C1) * (sigma1_sq + sigma2_sq + C2))
    return jnp.mean(ssim_map)


if __name__ == "__main__":
    key = jax.random.PRNGKey(0)
    k1, k2, k3, k4 = jax.random.split(key, 4)

    # Primary (stated operating point): small spatial -> fused lane-dense path.
    a1 = jax.random.uniform(k1, (2, 4, 16, 16), dtype=jnp.float32)
    a2 = jax.random.uniform(k2, (2, 4, 16, 16), dtype=jnp.float32)
    out_small = jax.block_until_ready(ssim_pallas(a1, a2))
    ref_small = ssim_reference(a1, a2)
    assert jnp.allclose(out_small, ref_small, atol=1e-5, rtol=1e-5), (
        float(out_small), float(ref_small))

    # Coverage for the larger-spatial separable path (per-channel tiles).
    b1 = jax.random.uniform(k3, (2, 3, 48, 48), dtype=jnp.float32)
    b2 = jax.random.uniform(k4, (2, 3, 48, 48), dtype=jnp.float32)
    out_big = jax.block_until_ready(ssim_pallas(b1, b2))
    ref_big = ssim_reference(b1, b2)
    assert jnp.allclose(out_big, ref_big, atol=1e-5, rtol=1e-5), (
        float(out_big), float(ref_big))

    print("KERNEL_OK")
</pallas_src>

<mosaic_0001>
module attributes {stable_mosaic.version = 11 : i64} {
  func.func @_fused_kernel(%arg0: i32, %arg1: i32, %arg2: memref<256x256xf32, #tpu.memory_space<vmem>>, %arg3: memref<1x1x1x256xf32, #tpu.memory_space<vmem>>, %arg4: memref<1x1x1x256xf32, #tpu.memory_space<vmem>>, %arg5: memref<1x1x1x128xf32, #tpu.memory_space<vmem>>) attributes {dimension_semantics = [#tpu.dimension_semantics<parallel>, #tpu.dimension_semantics<parallel>], iteration_bounds = array<i64: 2, 4>, scalar_prefetch = 0 : i64, scratch_operands = 0 : i64, tpu.core_type = #tpu.core_type<tc>, window_params = [{pipeline_mode = #tpu.pipeline_mode<synchronous>, transform_indices = @transform_0, window_bounds = array<i64: 256, 256>}, {transform_indices = @transform_1, window_bounds = array<i64: 1, 1, 1, 256>}, {transform_indices = @transform_2, window_bounds = array<i64: 1, 1, 1, 256>}, {transform_indices = @transform_3, window_bounds = array<i64: 1, 1, 1, 128>}]} {
    %c0 = arith.constant 0 : index
    %c0_0 = arith.constant 0 : index
    %c0_1 = arith.constant 0 : index
    %c0_2 = arith.constant 0 : index
    %0 = vector.load %arg3[%c0, %c0_0, %c0_1, %c0_2] : memref<1x1x1x256xf32, #tpu.memory_space<vmem>>, vector<1x1x1x256xf32>
    %1 = vector.shape_cast %0 : vector<1x1x1x256xf32> to vector<1x256xf32>
    %c0_3 = arith.constant 0 : index
    %c0_4 = arith.constant 0 : index
    %c0_5 = arith.constant 0 : index
    %c0_6 = arith.constant 0 : index
    %2 = vector.load %arg4[%c0_3, %c0_4, %c0_5, %c0_6] : memref<1x1x1x256xf32, #tpu.memory_space<vmem>>, vector<1x1x1x256xf32>
    %3 = vector.shape_cast %2 : vector<1x1x1x256xf32> to vector<1x256xf32>
    %c0_7 = arith.constant 0 : index
    %c0_8 = arith.constant 0 : index
    %4 = vector.load %arg2[%c0_7, %c0_8] : memref<256x256xf32, #tpu.memory_space<vmem>>, vector<256x256xf32>
    %cst = arith.constant dense<0.000000e+00> : vector<1x256xf32>
    %5 = tpu.matmul %1, %4, %cst {dimension_numbers = #tpu.dot_dimension_numbers<[1], [0], [0], [1], [0, 0, 1, 1], [], []>} : vector<1x256xf32>, vector<256x256xf32>, vector<1x256xf32> -> vector<1x256xf32>
    %cst_9 = arith.constant dense<0.000000e+00> : vector<1x256xf32>
    %6 = tpu.matmul %3, %4, %cst_9 {dimension_numbers = #tpu.dot_dimension_numbers<[1], [0], [0], [1], [0, 0, 1, 1], [], []>} : vector<1x256xf32>, vector<256x256xf32>, vector<1x256xf32> -> vector<1x256xf32>
    %7 = arith.mulf %1, %1 : vector<1x256xf32>
    %cst_10 = arith.constant dense<0.000000e+00> : vector<1x256xf32>
    %8 = tpu.matmul %7, %4, %cst_10 {dimension_numbers = #tpu.dot_dimension_numbers<[1], [0], [0], [1], [0, 0, 1, 1], [], []>} : vector<1x256xf32>, vector<256x256xf32>, vector<1x256xf32> -> vector<1x256xf32>
    %9 = arith.mulf %3, %3 : vector<1x256xf32>
    %cst_11 = arith.constant dense<0.000000e+00> : vector<1x256xf32>
    %10 = tpu.matmul %9, %4, %cst_11 {dimension_numbers = #tpu.dot_dimension_numbers<[1], [0], [0], [1], [0, 0, 1, 1], [], []>} : vector<1x256xf32>, vector<256x256xf32>, vector<1x256xf32> -> vector<1x256xf32>
    %11 = arith.mulf %1, %3 : vector<1x256xf32>
    %cst_12 = arith.constant dense<0.000000e+00> : vector<1x256xf32>
    %12 = tpu.matmul %11, %4, %cst_12 {dimension_numbers = #tpu.dot_dimension_numbers<[1], [0], [0], [1], [0, 0, 1, 1], [], []>} : vector<1x256xf32>, vector<256x256xf32>, vector<1x256xf32> -> vector<1x256xf32>
    %13 = arith.mulf %5, %5 : vector<1x256xf32>
    %14 = arith.mulf %6, %6 : vector<1x256xf32>
    %15 = arith.mulf %5, %6 : vector<1x256xf32>
    %cst_13 = arith.constant 2.000000e+00 : f32
    %16 = vector.broadcast %cst_13 : f32 to vector<1x256xf32>
    %17 = arith.mulf %16, %15 : vector<1x256xf32>
    %cst_14 = arith.constant 9.99999974E-5 : f32
    %18 = vector.broadcast %cst_14 : f32 to vector<1x256xf32>
    %19 = arith.addf %17, %18 : vector<1x256xf32>
    %20 = arith.subf %12, %15 : vector<1x256xf32>
    %cst_15 = arith.constant 2.000000e+00 : f32
    %21 = vector.broadcast %cst_15 : f32 to vector<1x256xf32>
    %22 = arith.mulf %21, %20 : vector<1x256xf32>
    %cst_16 = arith.constant 8.99999984E-4 : f32
    %23 = vector.broadcast %cst_16 : f32 to vector<1x256xf32>
    %24 = arith.addf %22, %23 : vector<1x256xf32>
    %25 = arith.mulf %19, %24 : vector<1x256xf32>
    %26 = arith.addf %13, %14 : vector<1x256xf32>
    %cst_17 = arith.constant 9.99999974E-5 : f32
    %27 = vector.broadcast %cst_17 : f32 to vector<1x256xf32>
    %28 = arith.addf %26, %27 : vector<1x256xf32>
    %29 = arith.subf %8, %13 : vector<1x256xf32>
    %30 = arith.subf %10, %14 : vector<1x256xf32>
    %31 = arith.addf %29, %30 : vector<1x256xf32>
    %cst_18 = arith.constant 8.99999984E-4 : f32
    %32 = vector.broadcast %cst_18 : f32 to vector<1x256xf32>
    %33 = arith.addf %31, %32 : vector<1x256xf32>
    %34 = arith.mulf %28, %33 : vector<1x256xf32>
    %35 = arith.divf %25, %34 : vector<1x256xf32>
    %36 = vector.shape_cast %35 : vector<1x256xf32> to vector<1x1x256xf32>
    %cst_19 = arith.constant dense<0.000000e+00> : vector<1xf32>
    %37 = vector.multi_reduction <add>, %36, %cst_19 [1, 2] : vector<1x1x256xf32> to vector<1xf32>
    %38 = vector.shape_cast %37 : vector<1xf32> to vector<1x1x1xf32>
    %39 = vector.extract %38[0, 0, 0] : f32 from vector<1x1x1xf32>
    %40 = vector.broadcast %39 : f32 to vector<1x1x1x128xf32>
    %c0_20 = arith.constant 0 : index
    %c0_21 = arith.constant 0 : index
    %c0_22 = arith.constant 0 : index
    %c0_23 = arith.constant 0 : index
    %41 = vector.load %arg5[%c0_20, %c0_21, %c0_22, %c0_23] : memref<1x1x1x128xf32, #tpu.memory_space<vmem>>, vector<1x1x1x128xf32>
    tpu.vector_store %arg5[%c0_20, %c0_21, %c0_22, %c0_23], %40 {strides = array<i32>} : memref<1x1x1x128xf32, #tpu.memory_space<vmem>>, vector<1x1x1x128xf32>,
    return
  }
  func.func @transform_0(%arg0: i32, %arg1: i32) -> (i32, i32) {
    %c0_i32 = arith.constant 0 : i32
    %c0_i32_0 = arith.constant 0 : i32
    %c0_i32_1 = arith.constant 0 : i32
    return %c0_i32, %c0_i32_0 : i32, i32
  }
  func.func @transform_1(%arg0: i32, %arg1: i32) -> (i32, i32, i32, i32) {
    %c0_i32 = arith.constant 0 : i32
    %c0_i32_0 = arith.constant 0 : i32
    %c0_i32_1 = arith.constant 0 : i32
    return %arg0, %arg1, %c0_i32, %c0_i32_0 : i32, i32, i32, i32
  }
  func.func @transform_2(%arg0: i32, %arg1: i32) -> (i32, i32, i32, i32) {
    %c0_i32 = arith.constant 0 : i32
    %c0_i32_0 = arith.constant 0 : i32
    %c0_i32_1 = arith.constant 0 : i32
    return %arg0, %arg1, %c0_i32, %c0_i32_0 : i32, i32, i32, i32
  }
  func.func @transform_3(%arg0: i32, %arg1: i32) -> (i32, i32, i32, i32) {
    %c0_i32 = arith.constant 0 : i32
    %c0_i32_0 = arith.constant 0 : i32
    %c0_i32_1 = arith.constant 0 : i32
    return %arg0, %arg1, %c0_i32, %c0_i32_0 : i32, i32, i32, i32
  }
}

</mosaic_0001>

<bundles_post_ra>
// kernel: tpu_custom_call.1
= control target key start
LH: loop header
LB: loop body
LE: loop exit
PB: predicated region body
PF: predicated region fallthrough
CT: control target
= control target key end

     0   :  { %s2148_s0 = inlined_call_operand.hbm [shape: f32[256,256], index: 0, kind: input, shape index: {}]   ;;  %s2149_s1 = inlined_call_operand.hbm [shape: f32[2,4,1,256], index: 1, kind: input, shape index: {}]   ;;  %s2150_s2 = inlined_call_operand.hbm [shape: f32[2,4,1,256], index: 2, kind: input, shape index: {}]   ;;  %s2151_s3 = inlined_call_operand.hbm [shape: f32[2,4,1,128], index: 3, kind: output, shape index: {}]  }
   0x1   :  { %2159 = sst [smem:[#allocation14_spill]] %s2149_s1 }
   0x2   :  { %2160 = sst [smem:[#allocation15_spill]] %s2150_s2 }
   0x3   :  { %8 = vsyncpa [#allocation3], 0 }
   0x4   :  { %9 = vsyncpa [#allocation6], 0 }
   0x5   :  { %11 = vsyncpa [#allocation6 + $0x1], 0 }
   0x6   :  { %12 = vsyncpa [#allocation4], 0 }
   0x7   :  { %14 = vsyncpa [#allocation4 + $0x1], 0  ;;  %s1581_s12 = smov 0   ;;  %s1583_s13 = smov 0  }
   0x8   :  { %s1585_s14 = smov 0   ;;  %s1587_s15 = smov 0  }
   0x9   :  { %s1589_s16 = smov 0   ;;  %s1591_s17 = smov 0  }
   0xa   :  { %s1593_s18 = smov 0   ;;  %s1595_s19 = smov 0  }
   0xb LB: > { %s29_s20 = sadd.s32 1, %s1545_s17  ;;  %s32_s21 = sadd.s32 1, %s1549_s18  ;;  %s1553_s19 = sphi %s1595_s19, %s20_s19   ;;  %s1549_s18 = sphi %s1593_s18, %s2187_s18   ;;  %s1545_s17 = sphi %s1591_s17, %s2186_s17   ;;  %s1541_s16 = sphi %s1589_s16, %s2185_s16   ;;  %s1537_s15 = sphi %s1587_s15, %s2184_s15   ;;  %s1533_s14 = sphi %s1585_s14, %s2183_s14   ;;  %s1529_s13 = sphi %s1583_s13, %s2182_s13   ;;  %s1525_s12 = sphi %s1581_s12, %s2181_s12  }
   0xc   : > { %p30_p0 = scmp.ge.s32.totalorder %s29_s20, 4  ;;  %s62_s22 = sadd.s32 1, %s1533_s14 }
   0xd   : > { %p69_p1 = scmp.ne.s32.totalorder %s1533_s14, %s1529_s13  ;;  %p70_p2 = scmp.eq.s32.totalorder %s1553_s19, 0 }
   0xe   : > { %s2189_s20 = smov (%p30_p0, %s29_s20), 0  ;;  %s2191_s21 = smov (!%p30_p0, %s32_s21), %s1549_s18 }
   0xf   : > { %2161 = sst [smem:[#allocation12_spill]] %s2189_s20  ;;  %s58_s23 = ssub.s32 %s1545_s17, %s2189_s20 }
  0x10   : > { %p1635_p3 = por %p70_p2, %p69_p1  ;;  %p34_p4 = scmp.ge.s32.totalorder %s2191_s21, 2 }
  0x11   : > { %p1289_p5 = scmp.lt.s32.totalorder %s1553_s19, 8  ;;  %s168_s25 = sand.u32 1, %s1553_s19  }
  0x12   : > { %s2193_s21 = smov (%p34_p4, %s2191_s21), 0  ;;  %s170_s26 = sand.u32 1, %s1533_s14  }
  0x13   : > { %2163 = sst [smem:[#allocation13_spill]] %s2193_s21  ;;  %s57_s27 = ssub.s32 %s1549_s18, %s2193_s21 }
  0x14   : > { %s1646_s28 = sshll.u32 %s170_s26, 1  ;;  %s59_s29 = sor.u32 %s58_s23, %s57_s27 }
  0x15   : > { %p60_p6 = scmp.eq.s32.totalorder %s59_s29, 0  ;;  %s926_s30 = sshll.u32 %s1545_s17, 1 }
  0x16   : > { %s927_s4 = sshll.u32 %s1549_s18, 3  ;;  %s172_s5 = scalar_lea.vmem [#allocation5], %s1646_s28 }
  0x17   : > { %s182_s6 = sshll.u32 %s172_s5, 4  ;;  %s1654_s8 = sadd.s32 %s927_s4, %s926_s30  ;;  %s1656_s6 = int_to_ptr.vmem [resolvable:$true] %s182_s6 }
  0x18   : > { %s1652_s7 = scalar_select %p60_p6, %s1533_s14, %s62_s22  }
  0x19   : > { %s928_s9 = sshll.u32 %s1654_s8, 4  ;;  %p1663_p7 = pnand %p1289_p5, %p1635_p3 }
  0x1a   : > { %s2165_s1 = sld [smem:[#allocation14_spill]]  ;;  %s1674_s26 = scalar_lea.sflag [#allocation6], %s168_s25 }
  0x1b   : > { %p1365_p9 = pneg %p1663_p7 }
  0x20   : > { %s1672_s22 = scalar_lea.hbm %s2165_s1, %s928_s9  ;;  %s1368_s30 = scalar_lea.hbm %s2165_s1, 256 }
  0x21   : > { %s1363_s24 = scalar_lea.hbm %s1672_s22, 32  ;;  %p1369_p12 = scmp.lt.u32.totalorder %s1672_s22, %s2165_s1 }
  0x22   : > { %p1364_p8 = scmp.ne.s32.totalorder %s1672_s22, %s1363_s24  ;;  %p1370_p13 = scmp.lt.u32.totalorder %s1368_s30, %s1363_s24 }
  0x23   : > { %p1372_p2 = scmp.lt.u32.totalorder %s1363_s24, %s1672_s22 }
  0x24   : > { %p1366_p10 = pnand %p1365_p9, %p1364_p8  ;;  %p1371_p0 = por %p1370_p13, %p1369_p12 }
  0x26   : > { %p1367_p11 = pneg %p1366_p10  ;;  %p1373_p3 = por %p1372_p2, %p1371_p0 }
  0x28   : > { %p1374_p4 = pnand %p1373_p3, %p1367_p11 }
  0x2a   : > { %1377 = shalt.err (!%p1374_p4)
}
  0x2b   : > { %s1378_s25 = scalar_lea.vmem %s1656_s6, 32  ;;  %s1555_s11 = smov [#allocation5]  }
  0x2c   : > { %p1379_p5 = scmp.ne.s32.totalorder %s1656_s6, %s1378_s25  ;;  %s1383_s23 = sshll.u32 %s1555_s11, 4  ;;  %s1384_s23 = int_to_ptr.vmem [resolvable:$false] %s1383_s23 }
  0x2d   : > { %s1385_s27 = scalar_lea.vmem %s1384_s23, 64  ;;  %p1386_p10 = scmp.lt.s32.totalorder %s1656_s6, %s1384_s23 }
  0x2e   : > { %p1381_p6 = pnand %p1379_p5, %p1365_p9  ;;  %p1387_p12 = scmp.lt.s32.totalorder %s1385_s27, %s1378_s25 }
  0x30   : > { %p1382_p8 = pneg %p1381_p6  ;;  %p1388_p13 = por %p1387_p12, %p1386_p10 }
  0x32   : > { %p1389_p0 = pnand %p1388_p13, %p1382_p8 }
  0x34   : > { %1392 = shalt.err (!%p1389_p0)
}
  0x35   : > { %1280 = dma.hbm_to_vmem [thread:$0]  (!%p1663_p7), %s1672_s22, 32, %s1656_s6, %s1674_s26  }
  0x36   : > { %s1703_s24 = sadd.s32 4294967295, %s1553_s19   ;;  %s921_s29 = sadd.s32 4294967294, %s1553_s19  }
  0x37   : > { %p75_p11 = scmp.ne.s32.totalorder %s1529_s13, %s1525_s12  ;;  %p2152_p2 = scmp.eq.s32.totalorder %s1703_s24, 0 }
  0x38   : > { %p129_p3 = scmp.eq.s32.totalorder %s1703_s24, 7  ;;  %p135_p4 = scmp.eq.s32.totalorder %s921_s29, 7 }
  0x39   : > { %p1712_p5 = por %p2152_p2, %p75_p11  ;;  %p922_p6 = scmp.ge.s32.totalorder %s1553_s19, 1 }
  0x3a   : > { %p1720_p8 = por %p129_p3, %p69_p1  ;;  %p1724_p10 = por %p135_p4, %p75_p11 }
  0x3b   : > { %s2166_s30 = scalar_select %p1712_p5, 1, 0 }
  0x3c   : > { %s2167_s6 = scalar_select %p1720_p8, 1, 0 }
  0x3d   : > { %s2168_s22 = scalar_select %p1724_p10, 1, 0 }
  0x3e   : > { %p142_p12 = scmp.lt.s32.totalorder %s1553_s19, 9  ;;  %s1556_s5 = smov [#allocation2]  }
  0x3f   : > { %s154_s25 = sshll.u32 %s1556_s5, 4  ;;  %s2170_s2 = sld [smem:[#allocation15_spill]]  ;;  %s1743_s25 = int_to_ptr.vmem [resolvable:$true] %s154_s25 }
  0x40   : > { %p1729_p13 = pnand %p922_p6, %p142_p12  ;;  %s193_s29 = scalar_lea.vmem [#allocation7], %s1646_s28 }
  0x41   : > { %s203_s1 = sshll.u32 %s193_s29, 4  ;;  %s204_s1 = int_to_ptr.vmem [resolvable:$true] %s203_s1 }
  0x42   : > { %s2169_s4 = scalar_select %p1729_p13, 1, 0 }
  0x43   : > { %p1273_p1 = pneg %p1729_p13 }
  0x45   : > { %s1738_s27 = scalar_lea.hbm %s2170_s2, %s928_s9  ;;  %p1747_p0 = pnand %p1273_p1, %p2152_p2 }
  0x46   : > { %s1393_s8 = scalar_lea.hbm %s1738_s27, 32  ;;  %s1398_s23 = scalar_lea.hbm %s2170_s2, 256 }
  0x47   : > { %s2171_s5 = scalar_select %p1747_p0, 1, 0 }
  0x48   : > { %p1394_p11 = scmp.ne.s32.totalorder %s1738_s27, %s1393_s8  ;;  %p1399_p6 = scmp.lt.u32.totalorder %s1738_s27, %s2170_s2 }
  0x49   : > { %p1400_p12 = scmp.lt.u32.totalorder %s1398_s23, %s1393_s8  ;;  %p1402_p1 = scmp.lt.u32.totalorder %s1393_s8, %s1738_s27 }
  0x4a   : > { %p1396_p3 = pnand %p1394_p11, %p1365_p9 }
  0x4b   : > { %p1401_p10 = por %p1400_p12, %p1399_p6 }
  0x4c   : > { %p1397_p4 = pneg %p1396_p3 }
  0x4d   : > { %p1403_p2 = por %p1402_p1, %p1401_p10 }
  0x4f   : > { %p1404_p8 = pnand %p1403_p2, %p1397_p4 }
  0x51   : > { %1407 = shalt.err (!%p1404_p8)
}
  0x52   : > { %s1408_s21 = scalar_lea.vmem %s204_s1, 32  ;;  %s1557_s20 = smov [#allocation7]  }
  0x53   : > { %p1409_p5 = scmp.ne.s32.totalorder %s204_s1, %s1408_s21  ;;  %s1413_s9 = sshll.u32 %s1557_s20, 4  ;;  %s1414_s9 = int_to_ptr.vmem [resolvable:$false] %s1413_s9 }
  0x54   : > { %s1415_s11 = scalar_lea.vmem %s1414_s9, 64  ;;  %p1416_p13 = scmp.lt.s32.totalorder %s204_s1, %s1414_s9 }
  0x55   : > { %p1411_p11 = pnand %p1409_p5, %p1365_p9  ;;  %p1417_p0 = scmp.lt.s32.totalorder %s1415_s11, %s1408_s21 }
  0x57   : > { %p1412_p3 = pneg %p1411_p11  ;;  %p1418_p6 = por %p1417_p0, %p1416_p13 }
  0x59   : > { %p1419_p12 = pnand %p1418_p6, %p1412_p3 }
  0x5b   : > { %1422 = shalt.err (!%p1419_p12)
}
  0x5c   : > { %1283 = dma.hbm_to_vmem [thread:$0]  (!%p1663_p7), %s1738_s27, 32, %s204_s1, %s1674_s26  }
  0x5d   : > { %s1423_s28 = scalar_lea.hbm %s2148_s0, 8192  ;;  %p2172_p2 = scmp.ne.s32.totalorder %s2171_s5, 0 }
  0x5e   : > { %p1424_p9 = scmp.ne.s32.totalorder %s2148_s0, %s1423_s28  ;;  %p1430_p13 = scmp.lt.u32.totalorder %s1423_s28, %s2148_s0 }
  0x5f   : > { %p1425_p5 = pneg %p2172_p2 }
  0x61   : > { %p1426_p8 = pnand %p1425_p5, %p1424_p9 }
  0x63   : > { %p1427_p10 = pneg %p1426_p8 }
  0x65   : > { %p1432_p0 = pnand %p1430_p13, %p1427_p10 }
  0x67   : > { %1435 = shalt.err (!%p1432_p0)
}
  0x68   : > { %s1436_s1 = scalar_lea.vmem %s1743_s25, 8192  ;;  %p1444_p11 = scmp.lt.s32.totalorder %s1743_s25, %s1743_s25 }
  0x69   : > { %p1437_p7 = scmp.ne.s32.totalorder %s1743_s25, %s1436_s1  ;;  %p1445_p3 = scmp.lt.s32.totalorder %s1436_s1, %s1436_s1 }
  0x6b   : > { %p1439_p4 = pnand %p1437_p7, %p1425_p5  ;;  %p1446_p6 = por %p1445_p3, %p1444_p11 }
  0x6d   : > { %p1440_p1 = pneg %p1439_p4 }
  0x6f   : > { %p1447_p12 = pnand %p1446_p6, %p1440_p1 }
  0x71   : > { %1450 = shalt.err (!%p1447_p12)
}
  0x72   : > { %s1558_s2 = smov 256   ;;  %s1559_s10 = smov 16  }
  0x73   : > { %1276 = dma.hbm_to_vmem [thread:$0]  (!%p2172_p2), %s2148_s0, 8192, %s1743_s25, [#allocation3], %s1558_s2, %s1558_s2, %s1559_s10  }
  0x74   : > { %p2173_p9 = scmp.ne.s32.totalorder %s2169_s4, 0 }
  0x75   : > { %p2174_p5 = scmp.eq.s32.totalorder (!%p2173_p9), %s1703_s24, 0 }
  0x76   : > { %212 = sbr.rel (%p2173_p9) target bundleno = 771 (0x303), region = 32 }
  0x7d   : > { %1512 = dma.done.wait (%p2174_p5), [#allocation3], 8192   ;;  %p2175_p8 = pmov %p2174_p5 }
  0x7e   : > { %s218_s9 = sand.u32 1, %s1703_s24   ;;  %s1800_s11 = sand.u32 1, %s1529_s13  }
  0x7f   : > { %1514 = vsyncadd (%p2175_p8), [#allocation3], 4294959104  ;;  %s935_s5 = sshll.u32 %s1800_s11, 1  ;;  %s219_s8 = scalar_lea.sflag [#allocation6], %s218_s9 }
  0x80   : > { %s1805_s25 = scalar_lea.vmem [#allocation5], %s935_s5  ;;  %p2176_p2 = scmp.ne.s32.totalorder %s2166_s30, 0 }
  0x82   : > { %1516 = dma.done.wait (%p2176_p2), %s219_s8, 64  }
  0x83   : > { %1518 = vsyncadd (%p2176_p2), %s219_s8, 4294967232  ;;  %v261_v0 = vld [vmem:[#allocation2 + $0x8] sm:$0xff]  ;;  %v263_v1 = vld [vmem:[#allocation2 + $0x18] sm:$0xff]  ;;  %v325_v25 = vlaneseq  ;;  %s231_s24 = scalar_lea.vmem [#allocation7], %s935_s5  ;;  %vm773_vm0 = vcmask 1040384   ;;  %s937_s30 = sshll.u32 %s1541_s16, 2 }
  0x84   : > { %v260_v2 = vld [vmem:[#allocation2] sm:$0xff]  ;;  %v1811_v3 = vpack.c.bf16 %v263_v1, %v261_v0  ;;  %v262_v4 = vld [vmem:[#allocation2 + $0x10] sm:$0xff]  ;;  %v265_v5 = vld [vmem:[#allocation2 + $0x28] sm:$0xff]  ;;  %s799_s4 = sadd.s32 %s1537_s15, %s937_s30  ;;  %s257_s23 = scalar_lea.vmem [#allocation8], %s1800_s11 }
  0x85   : > { %v267_v6 = vld [vmem:[#allocation2 + $0x38] sm:$0xff]  ;;  %v1813_v7 = vpack.c.bf16 %v262_v4, %v260_v2  ;;  %v264_v9 = vld [vmem:[#allocation2 + $0x20] sm:$0xff]  ;;  %v266_v10 = vld [vmem:[#allocation2 + $0x30] sm:$0xff]  ;;  %v1843_v32 = vshrl.u32 %v325_v25, 7  ;;  %s803_s28 = sshll.u32 %s257_s23, 4  ;;  %s938_s29 = sshll.u32 %s799_s4, 4  ;;  %s2091_s28 = int_to_ptr.vmem [resolvable:$true] %s803_s28 }
  0x86   : > { %v1815_v8 = vpack.c.bf16 %v267_v6, %v265_v5  ;;  %v269_v11 = vld [vmem:[#allocation2 + $0x48] sm:$0xff]  ;;  %942 = vmatprep.subr.bf16.mxu0 %v1811_v3  ;;  %1006 = vmatprep.subr.bf16.mxu1 %v1811_v3  ;;  %v271_v12 = vld [vmem:[#allocation2 + $0x58] sm:$0xff]  ;;  %v1821_v13 = vpack.c.bf16 %v266_v10, %v264_v9  ;;  %v268_v15 = vld [vmem:[#allocation2 + $0x40] sm:$0xff]  ;;  %s2096_s2 = scalar_lea.hbm %s2151_s3, %s938_s29  ;;  %s789_s10 = scalar_lea.sflag [#allocation4], %s1800_s11 }
  0x87   : > { %944 = vmatpush1.bf16.msra.mxu0 %v1813_v7  ;;  %1008 = vmatpush1.bf16.msra.mxu1 %v1813_v7  ;;  %v1825_v14 = vpack.c.bf16 %v271_v12, %v269_v11  ;;  %v270_v16 = vld [vmem:[#allocation2 + $0x50] sm:$0xff]  ;;  %v273_v17 = vld [vmem:[#allocation2 + $0x68] sm:$0xff]  ;;  %v275_v18 = vld [vmem:[#allocation2 + $0x78] sm:$0xff]  ;;  %v1854_v39 = vsub.s32 1, %v1843_v32  ;;  %s1451_s26 = scalar_lea.vmem %s2091_s28, 16  ;;  %p2177_p13 = scmp.ne.s32.totalorder %s2167_s6, 0 }
  0x88   : > { %946 = vmatprep.subr.bf16.mxu0 %v1815_v8  ;;  %1010 = vmatprep.subr.bf16.mxu1 %v1815_v8  ;;  %v1829_v19 = vpack.c.bf16 %v270_v16, %v268_v15  ;;  %v1833_v20 = vpack.c.bf16 %v275_v18, %v273_v17  ;;  %v272_v21 = vld [vmem:[#allocation2 + $0x60] sm:$0xff]  ;;  %v274_v22 = vld [vmem:[#allocation2 + $0x70] sm:$0xff]  ;;  %v277_v23 = vld [vmem:[#allocation2 + $0x88] sm:$0xff]  ;;  %p1452_p10 = scmp.ne.s32.totalorder %s2091_s28, %s1451_s26  ;;  %s1560_s15 = smov [#allocation8]  }
  0x89   : > { %v279_v24 = vld [vmem:[#allocation2 + $0x98] sm:$0xff]  ;;  %v1837_v26 = vpack.c.bf16 %v274_v22, %v272_v21  ;;  %v276_v28 = vld [vmem:[#allocation2 + $0x80] sm:$0xff]  ;;  %v278_v29 = vld [vmem:[#allocation2 + $0x90] sm:$0xff]  ;;  %s1455_s16 = sshll.u32 %s1560_s15, 4  ;;  %s1456_s16 = int_to_ptr.vmem [resolvable:$false] %s1455_s16 }
  0x8a   : > { %v1841_v27 = vpack.c.bf16 %v279_v24, %v277_v23  ;;  %v281_v30 = vld [vmem:[#allocation2 + $0xa8] sm:$0xff]  ;;  %v283_v31 = vld [vmem:[#allocation2 + $0xb8] sm:$0xff]  ;;  %v1847_v33 = vpack.c.bf16 %v278_v29, %v276_v28  ;;  %v280_v35 = vld [vmem:[#allocation2 + $0xa0] sm:$0xff]  ;;  %p1453_p0 = pnand %p1452_p10, %p2177_p13  ;;  %s1457_s27 = scalar_lea.vmem %s1456_s16, 32 }
  0x8b   : > { %948 = vmatpush1.bf16.msra.mxu0 %v1821_v13  ;;  %1012 = vmatpush1.bf16.msra.mxu1 %v1821_v13  ;;  %v1851_v34 = vpack.c.bf16 %v283_v31, %v281_v30  ;;  %v282_v36 = vld [vmem:[#allocation2 + $0xb0] sm:$0xff]  ;;  %v285_v37 = vld [vmem:[#allocation2 + $0xc8] sm:$0xff]  ;;  %v287_v38 = vld [vmem:[#allocation2 + $0xd8] sm:$0xff]  ;;  %p1458_p4 = scmp.lt.s32.totalorder %s2091_s28, %s1456_s16  ;;  %p1459_p1 = scmp.lt.s32.totalorder %s1457_s27, %s1451_s26 }
  0x8c   : > { %950 = vmatprep.subr.bf16.mxu0 %v1825_v14  ;;  %1014 = vmatprep.subr.bf16.mxu1 %v1825_v14  ;;  %v1858_v40 = vpack.c.bf16 %v282_v36, %v280_v35  ;;  %v284_v41 = vld [vmem:[#allocation2 + $0xc0] sm:$0xff]  ;;  %v1862_v42 = vpack.c.bf16 %v287_v38, %v285_v37  ;;  %v286_v43 = vld [vmem:[#allocation2 + $0xd0] sm:$0xff]  ;;  %v289_v46 = vld [vmem:[#allocation2 + $0xe8] sm:$0xff]  ;;  %p1454_p7 = pneg %p1453_p0 }
  0x8d   : > { %v1865_v44 = vld [vmem:[%s1805_s25] sm:$0x3]  ;;  %v1869_v45 = vld [vmem:[%s231_s24] sm:$0x3]  ;;  %v291_v47 = vld [vmem:[#allocation2 + $0xf8] sm:$0xff]  ;;  %v1877_v50 = vpack.c.bf16 %v286_v43, %v284_v41  ;;  %p1460_p11 = por %p1459_p1, %p1458_p4 }
  0x8e   : > { %v332_v48 = vrot.slane %v1865_v44, %v1854_v39  ;;  %v414_v49 = vrot.slane %v1869_v45, %v1854_v39  ;;  %v1881_v51 = vpack.c.bf16 %v291_v47, %v289_v46  ;;  %v288_v52 = vld [vmem:[#allocation2 + $0xe0] sm:$0xff]  ;;  %v290_v53 = vld [vmem:[#allocation2 + $0xf0] sm:$0xff]  ;;  %v293_v54 = vld [vmem:[#allocation2 + $0x108] sm:$0xff] }
  0x8f   : > { %952 = vmatpush1.bf16.msra.mxu0 %v1829_v19  ;;  %1016 = vmatpush1.bf16.msra.mxu1 %v1829_v19  ;;  %v295_v55 = vld [vmem:[#allocation2 + $0x118] sm:$0xff]  ;;  %v1885_v56 = vpack.c.bf16 %v290_v53, %v288_v52  ;;  %v292_v58 = vld [vmem:[#allocation2 + $0x100] sm:$0xff]  ;;  %v294_v59 = vld [vmem:[#allocation2 + $0x110] sm:$0xff]  ;;  %p1461_p3 = pnand %p1460_p11, %p1454_p7 }
  0x90   : > { %954 = vmatprep.subr.bf16.mxu0 %v1833_v20  ;;  %1018 = vmatprep.subr.bf16.mxu1 %v1833_v20  ;;  %v1889_v57 = vpack.c.bf16 %v295_v55, %v293_v54  ;;  %v297_v60 = vld [vmem:[#allocation2 + $0x128] sm:$0xff]  ;;  %v299_v61 = vld [vmem:[#allocation2 + $0x138] sm:$0xff]  ;;  %v1893_v62 = vpack.c.bf16 %v294_v59, %v292_v58  ;;  %v296_v0 = vld [vmem:[#allocation2 + $0x120] sm:$0xff]  ;;  %v1948_v59 = vsub.s32 0, %v1843_v32  ;;  %v1966_v32 = vmul.f32 %v1869_v45, %v1865_v44 }
  0x91   : > { %399 = vmatprep.mubr.f32.mxu0 %v332_v48  ;;  %481 = vmatprep.mubr.f32.mxu1 %v414_v49  ;;  %v1897_v63 = vpack.c.bf16 %v299_v61, %v297_v60  ;;  %v298_v1 = vld [vmem:[#allocation2 + $0x130] sm:$0xff]  ;;  %v301_v2 = vld [vmem:[#allocation2 + $0x148] sm:$0xff]  ;;  %v303_v4 = vld [vmem:[#allocation2 + $0x158] sm:$0xff]  ;;  %v1958_v61 = vmul.f32 %v1865_v44, %v1865_v44 }
  0x92   : > { %v1901_v5 = vpack.c.bf16 %v298_v1, %v296_v0  ;;  %v1905_v6 = vpack.c.bf16 %v303_v4, %v301_v2  ;;  %v300_v9 = vld [vmem:[#allocation2 + $0x140] sm:$0xff]  ;;  %v302_v10 = vld [vmem:[#allocation2 + $0x150] sm:$0xff]  ;;  %v305_v11 = vld [vmem:[#allocation2 + $0x168] sm:$0xff]  ;;  %v1962_v0 = vmul.f32 %v1869_v45, %v1869_v45  ;;  %v328_v1 = vrot.slane %v1865_v44, %v1948_v59 }
  0x93   : > { %956 = vmatpush1.bf16.msra.mxu0 %v1837_v26  ;;  %1020 = vmatpush1.bf16.msra.mxu1 %v1837_v26  ;;  %v307_v12 = vld [vmem:[#allocation2 + $0x178] sm:$0xff]  ;;  %v1909_v15 = vpack.c.bf16 %v302_v10, %v300_v9  ;;  %v304_v17 = vld [vmem:[#allocation2 + $0x160] sm:$0xff]  ;;  %v306_v18 = vld [vmem:[#allocation2 + $0x170] sm:$0xff]  ;;  %v410_v2 = vrot.slane %v1869_v45, %v1948_v59  ;;  %v663_v4 = vrot.slane %v1966_v32, %v1854_v39 }
  0x94   : > { %958 = vmatprep.subr.bf16.mxu0 %v1841_v27  ;;  %1022 = vmatprep.subr.bf16.mxu1 %v1841_v27  ;;  %v1913_v16 = vpack.c.bf16 %v307_v12, %v305_v11  ;;  %v309_v21 = vld [vmem:[#allocation2 + $0x188] sm:$0xff]  ;;  %v311_v22 = vld [vmem:[#allocation2 + $0x198] sm:$0xff]  ;;  %v1917_v23 = vpack.c.bf16 %v306_v18, %v304_v17  ;;  %v308_v25 = vld [vmem:[#allocation2 + $0x180] sm:$0xff]  ;;  %v659_v9 = vrot.slane %v1966_v32, %v1948_v59 }
  0x95   : > { %v1921_v24 = vpack.c.bf16 %v311_v22, %v309_v21  ;;  %v310_v28 = vld [vmem:[#allocation2 + $0x190] sm:$0xff]  ;;  %v313_v29 = vld [vmem:[#allocation2 + $0x1a8] sm:$0xff]  ;;  %v315_v30 = vld [vmem:[#allocation2 + $0x1b8] sm:$0xff]  ;;  %v497_v44 = vrot.slane %v1958_v61, %v1854_v39  ;;  %v580_v45 = vrot.slane %v1962_v0, %v1854_v39  ;;  %v493_v10 = vrot.slane %v1958_v61, %v1948_v59 }
  0x96   : > { %v1925_v31 = vpack.c.bf16 %v310_v28, %v308_v25  ;;  %v1929_v35 = vpack.c.bf16 %v315_v30, %v313_v29  ;;  %v312_v36 = vld [vmem:[#allocation2 + $0x1a0] sm:$0xff]  ;;  %v314_v37 = vld [vmem:[#allocation2 + $0x1b0] sm:$0xff]  ;;  %v317_v38 = vld [vmem:[#allocation2 + $0x1c8] sm:$0xff]  ;;  %v576_v11 = vrot.slane %v1962_v0, %v1948_v59 }
  0x97   : > { %960 = vmatpush1.bf16.msra.mxu0 %v1847_v33  ;;  %1024 = vmatpush1.bf16.msra.mxu1 %v1847_v33  ;;  %v319_v41 = vld [vmem:[#allocation2 + $0x1d8] sm:$0xff]  ;;  %v1933_v43 = vpack.c.bf16 %v314_v37, %v312_v36  ;;  %v316_v47 = vld [vmem:[#allocation2 + $0x1c0] sm:$0xff]  ;;  %v318_v48 = vld [vmem:[#allocation2 + $0x1d0] sm:$0xff] }
  0x98   : > { %962 = vmatprep.subr.bf16.mxu0 %v1851_v34  ;;  %1026 = vmatprep.subr.bf16.mxu1 %v1851_v34  ;;  %v1937_v46 = vpack.c.bf16 %v319_v41, %v317_v38  ;;  %v321_v49 = vld [vmem:[#allocation2 + $0x1e8] sm:$0xff]  ;;  %v323_v52 = vld [vmem:[#allocation2 + $0x1f8] sm:$0xff]  ;;  %v1941_v53 = vpack.c.bf16 %v318_v48, %v316_v47  ;;  %v320_v55 = vld [vmem:[#allocation2 + $0x1e0] sm:$0xff] }
  0x99   : > { %v1945_v54 = vpack.c.bf16 %v323_v52, %v321_v49  ;;  %v322_v58 = vld [vmem:[#allocation2 + $0x1f0] sm:$0xff] }
  0x9a   : > { %v1952_v60 = vpack.c.bf16 %v322_v58, %v320_v55 }
  0x9b   : > { %964 = vmatpush1.bf16.msra.mxu0 %v1858_v40  ;;  %1028 = vmatpush1.bf16.msra.mxu1 %v1858_v40 }
  0x9c   : > { %966 = vmatprep.subr.bf16.mxu0 %v1862_v42  ;;  %1030 = vmatprep.subr.bf16.mxu1 %v1862_v42 }
  0x9f   : > { %968 = vmatpush1.bf16.msra.mxu0 %v1877_v50  ;;  %1032 = vmatpush1.bf16.msra.mxu1 %v1877_v50 }
  0xa0   : > { %970 = vmatprep.subr.bf16.mxu0 %v1881_v51  ;;  %1034 = vmatprep.subr.bf16.mxu1 %v1881_v51 }
  0xa3   : > { %972 = vmatpush1.bf16.msra.mxu0 %v1885_v56  ;;  %1036 = vmatpush1.bf16.msra.mxu1 %v1885_v56 }
  0xa4   : > { %974 = vmatprep.subr.bf16.mxu0 %v1889_v57  ;;  %1038 = vmatprep.subr.bf16.mxu1 %v1889_v57 }
  0xa7   : > { %976 = vmatpush1.bf16.msra.mxu0 %v1893_v62  ;;  %1040 = vmatpush1.bf16.msra.mxu1 %v1893_v62 }
  0xa8   : > { %978 = vmatprep.subr.bf16.mxu0 %v1897_v63  ;;  %1042 = vmatprep.subr.bf16.mxu1 %v1897_v63 }
  0xab   : > { %980 = vmatpush1.bf16.msra.mxu0 %v1901_v5  ;;  %1044 = vmatpush1.bf16.msra.mxu1 %v1901_v5 }
  0xac   : > { %982 = vmatprep.subr.bf16.mxu0 %v1905_v6  ;;  %1046 = vmatprep.subr.bf16.mxu1 %v1905_v6 }
  0xaf   : > { %984 = vmatpush1.bf16.msra.mxu0 %v1909_v15  ;;  %1048 = vmatpush1.bf16.msra.mxu1 %v1909_v15 }
  0xb0   : > { %986 = vmatprep.subr.bf16.mxu0 %v1913_v16  ;;  %1050 = vmatprep.subr.bf16.mxu1 %v1913_v16 }
  0xb3   : > { %988 = vmatpush1.bf16.msra.mxu0 %v1917_v23  ;;  %1052 = vmatpush1.bf16.msra.mxu1 %v1917_v23 }
  0xb4   : > { %990 = vmatprep.subr.bf16.mxu0 %v1921_v24  ;;  %1054 = vmatprep.subr.bf16.mxu1 %v1921_v24 }
  0xb7   : > { %992 = vmatpush1.bf16.msra.mxu0 %v1925_v31  ;;  %1056 = vmatpush1.bf16.msra.mxu1 %v1925_v31 }
  0xb8   : > { %994 = vmatprep.subr.bf16.mxu0 %v1929_v35  ;;  %1058 = vmatprep.subr.bf16.mxu1 %v1929_v35 }
  0xbb   : > { %996 = vmatpush1.bf16.msra.mxu0 %v1933_v43  ;;  %1060 = vmatpush1.bf16.msra.mxu1 %v1933_v43 }
  0xbc   : > { %998 = vmatprep.subr.bf16.mxu0 %v1937_v46  ;;  %1062 = vmatprep.subr.bf16.mxu1 %v1937_v46 }
  0xbf   : > { %1000 = vmatpush1.bf16.msra.mxu0 %v1941_v53  ;;  %1064 = vmatpush1.bf16.msra.mxu1 %v1941_v53 }
  0xc0   : > { %1002 = vmatprep.subr.bf16.mxu0 %v1945_v54  ;;  %1066 = vmatprep.subr.bf16.mxu1 %v1945_v54 }
  0xc3   : > { %1004 = vmatpush1.bf16.msra.mxu0 %v1952_v60  ;;  %1068 = vmatpush1.bf16.msra.mxu1 %v1952_v60 }
  0xc4   : > { %1070 = vmatprep.subr.bf16.mxu0 %v1811_v3  ;;  %1134 = vmatprep.subr.bf16.mxu1 %v1811_v3 }
  0xc6   : > { %400 = vmatmul.mubr.f32.vlgmr.msra.gmra.mrb[0].mxu0 %v328_v1  ;;  %482 = vmatmul.mubr.f32.vlgmr.msra.gmra.mrb[0].mxu1 %v410_v2 }
  0xc7   : > { %1072 = vmatpush1.bf16.msra.mxu0 %v1813_v7  ;;  %1136 = vmatpush1.bf16.msra.mxu1 %v1813_v7 }
  0xc8   : > { %1074 = vmatprep.subr.bf16.mxu0 %v1815_v8  ;;  %1138 = vmatprep.subr.bf16.mxu1 %v1815_v8 }
  0xc9   : > { %564 = vmatprep.mubr.f32.mxu0 %v497_v44  ;;  %647 = vmatprep.mubr.f32.mxu1 %v580_v45 }
  0xcb   : > { %1076 = vmatpush1.bf16.msra.mxu0 %v1821_v13  ;;  %1140 = vmatpush1.bf16.msra.mxu1 %v1821_v13 }
  0xcc   : > { %1078 = vmatprep.subr.bf16.mxu0 %v1825_v14  ;;  %1142 = vmatprep.subr.bf16.mxu1 %v1825_v14 }
  0xcf   : > { %1080 = vmatpush1.bf16.msra.mxu0 %v1829_v19  ;;  %1144 = vmatpush1.bf16.msra.mxu1 %v1829_v19 }
  0xd0   : > { %1082 = vmatprep.subr.bf16.mxu0 %v1833_v20  ;;  %1146 = vmatprep.subr.bf16.mxu1 %v1833_v20 }
  0xd3   : > { %1084 = vmatpush1.bf16.msra.mxu0 %v1837_v26  ;;  %1148 = vmatpush1.bf16.msra.mxu1 %v1837_v26 }
  0xd4   : > { %1086 = vmatprep.subr.bf16.mxu0 %v1841_v27  ;;  %1150 = vmatprep.subr.bf16.mxu1 %v1841_v27 }
  0xd7   : > { %1088 = vmatpush1.bf16.msra.mxu0 %v1847_v33  ;;  %1152 = vmatpush1.bf16.msra.mxu1 %v1847_v33 }
  0xd8   : > { %1090 = vmatprep.subr.bf16.mxu0 %v1851_v34  ;;  %1154 = vmatprep.subr.bf16.mxu1 %v1851_v34 }
  0xdb   : > { %1092 = vmatpush1.bf16.msra.mxu0 %v1858_v40  ;;  %1156 = vmatpush1.bf16.msra.mxu1 %v1858_v40 }
  0xdc   : > { %1094 = vmatprep.subr.bf16.mxu0 %v1862_v42  ;;  %1158 = vmatprep.subr.bf16.mxu1 %v1862_v42 }
  0xdf   : > { %1096 = vmatpush1.bf16.msra.mxu0 %v1877_v50  ;;  %1160 = vmatpush1.bf16.msra.mxu1 %v1877_v50 }
  0xe0   : > { %1098 = vmatprep.subr.bf16.mxu0 %v1881_v51  ;;  %1162 = vmatprep.subr.bf16.mxu1 %v1881_v51 }
  0xe3   : > { %1100 = vmatpush1.bf16.msra.mxu0 %v1885_v56  ;;  %1164 = vmatpush1.bf16.msra.mxu1 %v1885_v56 }
  0xe4   : > { %1102 = vmatprep.subr.bf16.mxu0 %v1889_v57  ;;  %1166 = vmatprep.subr.bf16.mxu1 %v1889_v57 }
  0xe7   : > { %1104 = vmatpush1.bf16.msra.mxu0 %v1893_v62  ;;  %1168 = vmatpush1.bf16.msra.mxu1 %v1893_v62 }
  0xe8   : > { %1106 = vmatprep.subr.bf16.mxu0 %v1897_v63  ;;  %1170 = vmatprep.subr.bf16.mxu1 %v1897_v63 }
  0xeb   : > { %1108 = vmatpush1.bf16.msra.mxu0 %v1901_v5  ;;  %1172 = vmatpush1.bf16.msra.mxu1 %v1901_v5 }
  0xec   : > { %1110 = vmatprep.subr.bf16.mxu0 %v1905_v6  ;;  %1174 = vmatprep.subr.bf16.mxu1 %v1905_v6 }
  0xef   : > { %1112 = vmatpush1.bf16.msra.mxu0 %v1909_v15  ;;  %1176 = vmatpush1.bf16.msra.mxu1 %v1909_v15 }
  0xf0   : > { %1114 = vmatprep.subr.bf16.mxu0 %v1913_v16  ;;  %1178 = vmatprep.subr.bf16.mxu1 %v1913_v16 }
  0xf3   : > { %1116 = vmatpush1.bf16.msra.mxu0 %v1917_v23  ;;  %1180 = vmatpush1.bf16.msra.mxu1 %v1917_v23 }
  0xf4   : > { %1118 = vmatprep.subr.bf16.mxu0 %v1921_v24  ;;  %1182 = vmatprep.subr.bf16.mxu1 %v1921_v24 }
  0xf7   : > { %1120 = vmatpush1.bf16.msra.mxu0 %v1925_v31  ;;  %1184 = vmatpush1.bf16.msra.mxu1 %v1925_v31 }
  0xf8   : > { %1122 = vmatprep.subr.bf16.mxu0 %v1929_v35  ;;  %1186 = vmatprep.subr.bf16.mxu1 %v1929_v35 }
  0xfb   : > { %1124 = vmatpush1.bf16.msra.mxu0 %v1933_v43  ;;  %1188 = vmatpush1.bf16.msra.mxu1 %v1933_v43 }
  0xfc   : > { %1126 = vmatprep.subr.bf16.mxu0 %v1937_v46  ;;  %1190 = vmatprep.subr.bf16.mxu1 %v1937_v46 }
  0xff   : > { %1128 = vmatpush1.bf16.msra.mxu0 %v1941_v53  ;;  %1192 = vmatpush1.bf16.msra.mxu1 %v1941_v53 }
 0x100   : > { %1130 = vmatprep.subr.bf16.mxu0 %v1945_v54  ;;  %1194 = vmatprep.subr.bf16.mxu1 %v1945_v54 }
 0x103   : > { %1132 = vmatpush1.bf16.msra.mxu0 %v1952_v60  ;;  %1196 = vmatpush1.bf16.msra.mxu1 %v1952_v60 }
 0x104   : > { %1198 = vmatprep.subr.bf16.mxu0 %v1811_v3 }
 0x106   : > { %565 = vmatmul.mubr.f32.vlgmr.msra.gmra.mrb[2].mxu0 %v493_v10  ;;  %648 = vmatmul.mubr.f32.vlgmr.msra.gmra.mrb[2].mxu1 %v576_v11 }
 0x107   : > { %1200 = vmatpush1.bf16.msra.mxu0 %v1813_v7  ;;  %730 = vmatprep.mubr.f32.mxu0 %v663_v4 }
 0x108   : > { %1202 = vmatprep.subr.bf16.mxu0 %v1815_v8 }
 0x10b   : > { %1204 = vmatpush1.bf16.msra.mxu0 %v1821_v13 }
 0x10c   : > { %1206 = vmatprep.subr.bf16.mxu0 %v1825_v14 }
 0x10f   : > { %1208 = vmatpush1.bf16.msra.mxu0 %v1829_v19 }
 0x110   : > { %1210 = vmatprep.subr.bf16.mxu0 %v1833_v20 }
 0x113   : > { %1212 = vmatpush1.bf16.msra.mxu0 %v1837_v26 }
 0x114   : > { %1214 = vmatprep.subr.bf16.mxu0 %v1841_v27 }
 0x117   : > { %1216 = vmatpush1.bf16.msra.mxu0 %v1847_v33 }
 0x118   : > { %1218 = vmatprep.subr.bf16.mxu0 %v1851_v34 }
 0x11b   : > { %1220 = vmatpush1.bf16.msra.mxu0 %v1858_v40 }
 0x11c   : > { %1222 = vmatprep.subr.bf16.mxu0 %v1862_v42 }
 0x11f   : > { %1224 = vmatpush1.bf16.msra.mxu0 %v1877_v50 }
 0x120   : > { %1226 = vmatprep.subr.bf16.mxu0 %v1881_v51 }
 0x123   : > { %1228 = vmatpush1.bf16.msra.mxu0 %v1885_v56 }
 0x124   : > { %1230 = vmatprep.subr.bf16.mxu0 %v1889_v57 }
 0x127   : > { %1232 = vmatpush1.bf16.msra.mxu0 %v1893_v62 }
 0x128   : > { %1234 = vmatprep.subr.bf16.mxu0 %v1897_v63 }
 0x12b   : > { %1236 = vmatpush1.bf16.msra.mxu0 %v1901_v5 }
 0x12c   : > { %1238 = vmatprep.subr.bf16.mxu0 %v1905_v6 }
 0x12f   : > { %1240 = vmatpush1.bf16.msra.mxu0 %v1909_v15 }
 0x130   : > { %1242 = vmatprep.subr.bf16.mxu0 %v1913_v16 }
 0x133   : > { %1244 = vmatpush1.bf16.msra.mxu0 %v1917_v23 }
 0x134   : > { %1246 = vmatprep.subr.bf16.mxu0 %v1921_v24 }
 0x137   : > { %1248 = vmatpush1.bf16.msra.mxu0 %v1925_v31 }
 0x138   : > { %1250 = vmatprep.subr.bf16.mxu0 %v1929_v35 }
 0x13b   : > { %1252 = vmatpush1.bf16.msra.mxu0 %v1933_v43 }
 0x13c   : > { %1254 = vmatprep.subr.bf16.mxu0 %v1937_v46 }
 0x13f   : > { %1256 = vmatpush1.bf16.msra.mxu0 %v1941_v53 }
 0x140   : > { %1258 = vmatprep.subr.bf16.mxu0 %v1945_v54 }
 0x143   : > { %1260 = vmatpush1.bf16.msra.mxu0 %v1952_v60 }
 0x146   : > { %731 = vmatmul.mubr.f32.vlgmr.msra.gmra.mrb[4].mxu0 %v659_v9 }
 0x199   : > { %v401_v3 = vpop.f32.mrb[0].mxu0  ;;  %v483_v7 = vpop.f32.mrb[0].mxu1 }
 0x19a   : > { %v737_v8 = vmul.f32 %v401_v3, %v401_v3  ;;  %v739_v13 = vmul.f32 %v483_v7, %v483_v7  ;;  %v741_v14 = vmul.f32 %v483_v7, %v401_v3  ;;  %v403_v19 = vpop.f32.mrb[1].mxu0  ;;  %v485_v20 = vpop.f32.mrb[1].mxu1 }
 0x19b   : > { %v738_v26 = vmul.f32 %v403_v19, %v403_v19  ;;  %v740_v27 = vmul.f32 %v485_v20, %v485_v20  ;;  %v742_v33 = vmul.f32 %v485_v20, %v403_v19 }
 0x19c   : > { %v755_v34 = vadd.f32 %v739_v13, %v737_v8  ;;  %v743_v23 = vmul.f32 2.0, %v741_v14 }
 0x19d   : > { %v756_v39 = vadd.f32 %v740_v27, %v738_v26  ;;  %v744_v28 = vmul.f32 2.0, %v742_v33 }
 0x19e   : > { %v757_v12 = vadd.f32 0.0001, %v755_v34  ;;  %v745_v35 = vadd.f32 0.0001, %v743_v23 }
 0x19f   : > { %v758_v16 = vadd.f32 0.0001, %v756_v39  ;;  %v746_v37 = vadd.f32 0.0001, %v744_v28 }
 0x1d9   : > { %v566_v40 = vpop.f32.mrb[2].mxu0  ;;  %v649_v42 = vpop.f32.mrb[2].mxu1 }
 0x1da   : > { %v759_v50 = vsub.f32 %v566_v40, %v737_v8  ;;  %v761_v51 = vsub.f32 %v649_v42, %v739_v13  ;;  %v568_v56 = vpop.f32.mrb[3].mxu0  ;;  %v651_v57 = vpop.f32.mrb[3].mxu1 }
 0x1db   : > { %v760_v62 = vsub.f32 %v568_v56, %v738_v26  ;;  %v762_v63 = vsub.f32 %v651_v57, %v740_v27 }
 0x1dc   : > { %v763_v5 = vadd.f32 %v761_v51, %v759_v50 }
 0x1dd   : > { %v764_v6 = vadd.f32 %v762_v63, %v760_v62 }
 0x1de   : > { %v765_v15 = vadd.f32 0.0009, %v763_v5 }
 0x1df   : > { %v766_v17 = vadd.f32 0.0009, %v764_v6 }
 0x1e0   : > { %v767_v18 = vmul.f32 %v765_v15, %v757_v12 }
 0x1e1   : > { %v768_v21 = vmul.f32 %v766_v17, %v758_v16 }
 0x1e2   : > { %1359 = vrcp.f32 %v767_v18 }
 0x1e3   : > { %1361 = vrcp.f32 %v768_v21 }
 0x1ec   : > { %v1360_v43 = vpop.eup %1359 }
 0x1ed   : > { %v1362_v47 = vpop.eup %1361 }
 0x219   : > { %v732_v22 = vpop.f32.mrb[4].mxu0 }
 0x21a   : > { %v747_v24 = vsub.f32 %v732_v22, %v741_v14  ;;  %v734_v25 = vpop.f32.mrb[5].mxu0 }
 0x21b   : > { %v748_v29 = vsub.f32 %v734_v25, %v742_v33 }
 0x21c   : > { %v749_v30 = vmul.f32 2.0, %v747_v24 }
 0x21d   : > { %v750_v31 = vmul.f32 2.0, %v748_v29 }
 0x21e   : > { %v751_v36 = vadd.f32 0.0009, %v749_v30 }
 0x21f   : > { %v752_v38 = vadd.f32 0.0009, %v750_v31 }
 0x220   : > { %v753_v41 = vmul.f32 %v751_v36, %v745_v35 }
 0x221   : > { %v754_v46 = vmul.f32 %v752_v38, %v746_v37 }
 0x222   : > { %v770_v48 = vmul.f32 %v1360_v43, %v753_v41 }
 0x223   : > { %v772_v49 = vmul.f32 %v1362_v47, %v754_v46 }
 0x224   : > { %v774_v52 = vsel %vm773_vm0, %v770_v48, 0.0 }
 0x225   : > { %v775_v53 = vsel %vm773_vm0, %v772_v49, 0.0 }
 0x226   : > { %v776_v54 = vadd.f32 %v775_v53, %v774_v52 }
 0x228   : > { %777 = vadd.xlane.f32.xlu0 %v776_v54 }
 0x2b5   : > { %v778_v55 = vpop.xlane.xlu0 %777 }
 0x2b6   : > { %v779_v58 = vrot.slane %v778_v55, 4 }
 0x2b8   : > { %v780_v59 = vadd.f32 %v779_v58, %v778_v55 }
 0x2ba   : > { %v781_v60 = vrot.slane %v780_v59, 2 }
 0x2bc   : > { %v782_v61 = vadd.f32 %v781_v60, %v780_v59 }
 0x2be   : > { %v783_v0 = vrot.slane %v782_v61, 1 }
 0x2c0   : > { %v784_v32 = vadd.f32 %v783_v0, %v782_v61 }
 0x2c2   : > { %1261 = vpush %v784_v32 }
 0x2f3   : > { %s1262_s20 = spop %1261 }
 0x2f4   : > { %v786_v1 = vstv %s1262_s20 }
 0x2f5   : > { %787 = vst [vmem:[%s257_s23] sm:$0x1] %v786_v1 }
 0x2f6   : > { %1464 = shalt.err (!%p1461_p3)
}
 0x2f7   : > { %s1465_s9 = scalar_lea.hbm %s2096_s2, 16  ;;  %s1469_s8 = scalar_lea.hbm %s2151_s3, 128 }
 0x2f8   : > { %p1466_p6 = scmp.ne.s32.totalorder %s2096_s2, %s1465_s9  ;;  %p1470_p5 = scmp.lt.u32.totalorder %s2096_s2, %s2151_s3 }
 0x2f9   : > { %p1471_p8 = scmp.lt.u32.totalorder %s1469_s8, %s1465_s9  ;;  %p1473_p10 = scmp.lt.u32.totalorder %s1465_s9, %s2096_s2 }
 0x2fa   : > { %p1467_p12 = pnand %p1466_p6, %p2177_p13 }
 0x2fb   : > { %p1472_p2 = por %p1471_p8, %p1470_p5 }
 0x2fc   : > { %p1468_p9 = pneg %p1467_p12 }
 0x2fd   : > { %p1474_p0 = por %p1473_p10, %p1472_p2 }
 0x2ff   : > { %p1475_p7 = pnand %p1474_p0, %p1468_p9 }
 0x301   : > { %1478 = shalt.err (!%p1475_p7)
}
 0x302   : > { %1271 = dma.vmem_to_hbm [thread:$0]  (%p2177_p13), %s2091_s28, 16, %s2096_s2, %s789_s10  }
 0x303 PF: > { %p1291_p4 = scmp.ge.s32.totalorder %s1553_s19, 2  ;;  %s815_s30 = sand.u32 1, %s1525_s12  }
 0x304   : > { %p2178_p1 = scmp.ne.s32.totalorder %s2168_s22, 0  ;;  %s816_s4 = scalar_lea.sflag [#allocation4], %s815_s30 }
 0x306   : > { %p1285_p11 = pnand %p1291_p4, %p2178_p1 }
 0x308   : > { %1520 = dma.done.wait (!%p1285_p11), %s816_s4, 16  }
 0x309   : > { %1522 = vsyncadd (!%p1285_p11), %s816_s4, 4294967280  ;;  %s20_s19 = sadd.s32 1, %s1553_s19   ;;  %s2179_s6 = sld [smem:[#allocation12_spill]] }
 0x30a   : > { %p17_p3 = scmp.ge.s32.totalorder %s20_s19, 10   ;;  %s2180_s23 = sld [smem:[#allocation13_spill]] }
 0x30b   : > { %s2181_s12 = smov %s1529_s13  ;;  %s2182_s13 = smov %s1533_s14 }
 0x30c   : > { %s2183_s14 = smov %s1652_s7  ;;  %s2184_s15 = smov %s1545_s17 }
 0x30d   : > { %s2185_s16 = smov %s1549_s18  ;;  %19 = sbr.rel (!%p17_p3) target bundleno = 11 (0xb), region = 93 }
 0x30f   : > { %s2186_s17 = smov %s2179_s6 }
 0x310   : > { %s2187_s18 = smov %s2180_s23 }
 0x314   :  { %820 = vsyncpa [#allocation3], 1 }
 0x315   :  { %822 = vsyncpa [#allocation3 + $0x1], 1 }
 0x316   :  { %823 = vsyncpa [#allocation6], 1 }
 0x317   :  { %825 = vsyncpa [#allocation6 + $0x1], 1 }
 0x318   :  { %826 = vsyncpa [#allocation4], 1 }
 0x319   :  { %828 = vsyncpa [#allocation4 + $0x1], 1 }

</bundles_post_ra>
